<compile_context>
chip_gen: v6e
topology: v6e:2x2x1
jax: 0.10.0
libtpu: 0.0.40
codegen_flags: <defaults>
</compile_context>

<pallas_src>
import jax
import jax.numpy as jnp
from jax.experimental import pallas as pl
from jax.experimental.pallas import tpu as pltpu

LANE = 128
SUBLANE = 8
_VMEM_LIMIT = 48 * 1024 * 1024   # explicit scoped-VMEM budget; safe on v5e/v6e (128 MiB) and v7x (64 MiB)


def _round_up(x, m):
    return ((x + m - 1) // m) * m


def _tile_and_pad(dim, max_tile, align):
    """Pick a tile size (<= max_tile, aligned) and the padded extent it divides."""
    if dim >= max_tile:
        tile = max_tile
    else:
        tile = _round_up(dim, align)
    return tile, _round_up(dim, tile)


# ---------------------------------------------------------------------------
# Kernel 1: xw = x_flat @ W^T   (single lane-dense matmul over all B*N rows)
# ---------------------------------------------------------------------------
def _linear_kernel(x_ref, w_ref, o_ref):
    # x_ref: (TR, Din), w_ref: (Din, Dout_p), o_ref: (TR, Dout_p)
    o_ref[...] = jnp.dot(
        x_ref[...], w_ref[...], preferred_element_type=jnp.float32
    ).astype(o_ref.dtype)


# ---------------------------------------------------------------------------
# Kernel 2: out = adj @ xw + b  (tiled over output rows and the K=N reduction)
# ---------------------------------------------------------------------------
def _adj_matmul_kernel(adj_ref, xw_ref, b_ref, o_ref, acc_ref):
    # adj_ref: (Bb, TM, TK), xw_ref: (Bb, TK, Dout_p), b_ref: (1, Dout_p) f32
    # o_ref:   (Bb, TM, Dout_p), acc_ref: (Bb, TM, Dout_p) f32 scratch
    k = pl.program_id(2)

    @pl.when(k == 0)
    def _():
        acc_ref[...] = jnp.zeros_like(acc_ref)

    acc_ref[...] += jnp.einsum(
        "bmk,bkn->bmn", adj_ref[...], xw_ref[...],
        preferred_element_type=jnp.float32)

    @pl.when(k == pl.num_programs(2) - 1)
    def _():
        # Bias add + downcast only on the finalize step (kept off the MXU path).
        o_ref[...] = (acc_ref[...] + b_ref[...]).astype(o_ref.dtype)


def graph_convolution(input_feature, adjacency, weight, bias, *,
                      compute_dtype=None, tile_m=256, tile_k=256):
    """input_feature: (B, N, Din); adjacency: (B, N, N);
       weight: (Dout, Din)  (PyTorch nn.Linear layout); bias: (Dout,)."""
    B, N, Din = input_feature.shape
    Dout = weight.shape[0]
    out_dtype = input_feature.dtype
    if compute_dtype is None:
        compute_dtype = input_feature.dtype
    itemsize = jnp.dtype(compute_dtype).itemsize

    # ---- padded / tiled sizes ----------------------------------------------
    Dout_p = _round_up(Dout, LANE)                 # lane-dense output columns
    TM, N_m = _tile_and_pad(N, tile_m, SUBLANE)    # output-row tiling of adj @ xw
    TK, N_k = _tile_and_pad(N, tile_k, SUBLANE)    # reduction tiling (adj cols / xw rows)

    # Fold the whole batch into one grid step when the tiles are small enough
    # (amortizes the ~0.35us per-grid-step overhead for tiny N).
    per_batch_bytes = (TM * TK + TK * Dout_p + TM * Dout_p) * itemsize + TM * Dout_p * 4
    Bb = B if B * per_batch_bytes <= (4 << 20) else 1

    # ---- pad + cast operands (one-time glue, outside the kernels) -----------
    adj_p = jnp.pad(adjacency.astype(compute_dtype),
                    ((0, 0), (0, N_m - N), (0, N_k - N)))
    x_p = jnp.pad(input_feature.astype(compute_dtype),
                  ((0, 0), (0, N_k - N), (0, 0)))
    w_p = jnp.pad(weight.T.astype(compute_dtype), ((0, 0), (0, Dout_p - Dout)))
    b_p = jnp.pad(bias.astype(jnp.float32), (0, Dout_p - Dout)).reshape(1, Dout_p)

    # ---- kernel 1: xw = x @ W^T as one (B*N_k, Din) x (Din, Dout_p) matmul ---
    # TODO(synk): Din / Dout_p are loaded whole per step (fine for typical GCN widths);
    # tile them too if this layer is ever used with very large feature dims.
    R = B * N_k
    x2 = x_p.reshape(R, Din)
    TR = R
    if R > 1024:
        TR = TK
        while TR * 2 <= 1024 and R % (TR * 2) == 0:
            TR *= 2

    xw = pl.pallas_call(
        _linear_kernel,
        out_shape=jax.ShapeDtypeStruct((R, Dout_p), compute_dtype),
        grid_spec=pltpu.PrefetchScalarGridSpec(
            num_scalar_prefetch=0,
            grid=(R // TR,),
            in_specs=[
                pl.BlockSpec((TR, Din), lambda i: (i, 0)),
                pl.BlockSpec((Din, Dout_p), lambda i: (0, 0)),
            ],
            out_specs=pl.BlockSpec((TR, Dout_p), lambda i: (i, 0)),
        ),
        compiler_params=pltpu.CompilerParams(
            dimension_semantics=("parallel",),
            vmem_limit_bytes=_VMEM_LIMIT,
        ),
    )(x2, w_p)
    xw = xw.reshape(B, N_k, Dout_p)

    # ---- kernel 2: out = adj @ xw + b, tiled with an f32 VMEM accumulator ----
    out_p = pl.pallas_call(
        _adj_matmul_kernel,
        out_shape=jax.ShapeDtypeStruct((B, N_m, Dout_p), out_dtype),
        grid_spec=pltpu.PrefetchScalarGridSpec(
            num_scalar_prefetch=0,
            grid=(B // Bb, N_m // TM, N_k // TK),
            in_specs=[
                pl.BlockSpec((Bb, TM, TK), lambda b, m, k: (b, m, k)),
                pl.BlockSpec((Bb, TK, Dout_p), lambda b, m, k: (b, k, 0)),
                pl.BlockSpec((1, Dout_p), lambda b, m, k: (0, 0)),
            ],
            out_specs=pl.BlockSpec((Bb, TM, Dout_p), lambda b, m, k: (b, m, 0)),
            scratch_shapes=[pltpu.VMEM((Bb, TM, Dout_p), jnp.float32)],
        ),
        compiler_params=pltpu.CompilerParams(
            dimension_semantics=("parallel", "parallel", "arbitrary"),
            vmem_limit_bytes=_VMEM_LIMIT,
        ),
    )(adj_p, xw, b_p)

    return out_p[:, :N, :Dout]


if __name__ == "__main__":
    # Small shapes consistent with the module: batch=2, nodes=8, input_dim=32, output_dim=32
    B, N, Din, Dout = 2, 8, 32, 32

    key = jax.random.PRNGKey(0)
    k1, k2, k3, k4 = jax.random.split(key, 4)

    # nn.Linear shapes: weight (Dout, Din), bias (Dout,)
    weight = jax.random.normal(k1, (Dout, Din), dtype=jnp.float32) * 0.1
    bias = jax.random.normal(k2, (Dout,), dtype=jnp.float32) * 0.1

    input_feature = jax.random.normal(k3, (B, N, Din), dtype=jnp.float32)
    adjacency = jax.random.uniform(k4, (B, N, N), dtype=jnp.float32)

    # Reference (plain JAX, same semantics as the PyTorch forward)
    ref = jnp.matmul(adjacency, input_feature) @ weight.T + bias

    # fp32 path (default): tight tolerance
    out = graph_convolution(input_feature, adjacency, weight, bias)
    out = jax.block_until_ready(out)
    assert out.shape == (B, N, Dout)
    assert jnp.allclose(out, ref, atol=1e-4, rtol=1e-4)

    # bf16-streamed path (f32 accumulation): looser tolerance
    out_bf16 = graph_convolution(input_feature, adjacency, weight, bias,
                                 compute_dtype=jnp.bfloat16)
    out_bf16 = jax.block_until_ready(out_bf16)
    assert out_bf16.shape == (B, N, Dout)
    assert jnp.allclose(out_bf16, ref, atol=5e-2, rtol=5e-2)

    print("KERNEL_OK")
</pallas_src>

<mosaic_0001>
module attributes {stable_mosaic.version = 11 : i64} {
  func.func @_linear_kernel(%arg0: i32, %arg1: memref<16x32xf32, #tpu.memory_space<vmem>>, %arg2: memref<32x128xf32, #tpu.memory_space<vmem>>, %arg3: memref<16x128xf32, #tpu.memory_space<vmem>>) attributes {dimension_semantics = [#tpu.dimension_semantics<parallel>], iteration_bounds = array<i64: 1>, scalar_prefetch = 0 : i64, scratch_operands = 0 : i64, tpu.core_type = #tpu.core_type<tc>, window_params = [{transform_indices = @transform_0, window_bounds = array<i64: 16, 32>}, {pipeline_mode = #tpu.pipeline_mode<synchronous>, transform_indices = @transform_1, window_bounds = array<i64: 32, 128>}, {transform_indices = @transform_2, window_bounds = array<i64: 16, 128>}]} {
    %c0 = arith.constant 0 : index
    %c0_0 = arith.constant 0 : index
    %0 = vector.load %arg1[%c0, %c0_0] : memref<16x32xf32, #tpu.memory_space<vmem>>, vector<16x32xf32>
    %c0_1 = arith.constant 0 : index
    %c0_2 = arith.constant 0 : index
    %1 = vector.load %arg2[%c0_1, %c0_2] : memref<32x128xf32, #tpu.memory_space<vmem>>, vector<32x128xf32>
    %cst = arith.constant dense<0.000000e+00> : vector<16x128xf32>
    %2 = tpu.matmul %0, %1, %cst {dimension_numbers = #tpu.dot_dimension_numbers<[1], [0], [0], [1], [0, 0, 1, 1], [], []>} : vector<16x32xf32>, vector<32x128xf32>, vector<16x128xf32> -> vector<16x128xf32>
    %c0_3 = arith.constant 0 : index
    %c0_4 = arith.constant 0 : index
    %3 = vector.load %arg3[%c0_3, %c0_4] : memref<16x128xf32, #tpu.memory_space<vmem>>, vector<16x128xf32>
    tpu.vector_store %arg3[%c0_3, %c0_4], %2 {strides = array<i32>} : memref<16x128xf32, #tpu.memory_space<vmem>>, vector<16x128xf32>,
    return
  }
  func.func @transform_0(%arg0: i32) -> (i32, i32) {
    %c0_i32 = arith.constant 0 : i32
    %c0_i32_0 = arith.constant 0 : i32
    return %arg0, %c0_i32 : i32, i32
  }
  func.func @transform_1(%arg0: i32) -> (i32, i32) {
    %c0_i32 = arith.constant 0 : i32
    %c0_i32_0 = arith.constant 0 : i32
    %c0_i32_1 = arith.constant 0 : i32
    return %c0_i32, %c0_i32_0 : i32, i32
  }
  func.func @transform_2(%arg0: i32) -> (i32, i32) {
    %c0_i32 = arith.constant 0 : i32
    %c0_i32_0 = arith.constant 0 : i32
    return %arg0, %c0_i32 : i32, i32
  }
}

</mosaic_0001>

<bundles_post_ra>
// kernel: tpu_custom_call.1
= control target key start
LH: loop header
LB: loop body
LE: loop exit
PB: predicated region body
PF: predicated region fallthrough
CT: control target
= control target key end

     0   :  { %7 = vsyncpa [#allocation3], 0  ;;  %s278_s0 = inlined_call_operand.hbm [shape: f32[16,32], index: 0, kind: input, shape index: {}]   ;;  %s279_s1 = inlined_call_operand.hbm [shape: f32[32,128], index: 1, kind: input, shape index: {}]   ;;  %s280_s2 = inlined_call_operand.hbm [shape: f32[16,128], index: 2, kind: output, shape index: {}]  }
   0x1   :  { %8 = vsyncpa [#allocation6], 0 }
   0x2   :  { %9 = vsyncpa [#allocation4], 0  ;;  %s238_s9 = smov [#allocation2]  }
   0x3   :  { %s15_s10 = sshll.u32 %s238_s9, 4  ;;  %s16_s10 = int_to_ptr.vmem [resolvable:$true] %s15_s10 }
   0x4   :  { %s180_s11 = scalar_lea.vmem %s16_s10, 256  ;;  %p185_p1 = scmp.lt.s32.totalorder %s16_s10, %s16_s10 }
   0x5   :  { %p181_p0 = scmp.ne.s32.totalorder %s16_s10, %s180_s11  ;;  %p186_p2 = scmp.lt.s32.totalorder %s180_s11, %s180_s11 }
   0x7   :  { %p187_p3 = por %p186_p2, %p185_p1 }
   0x9   :  { %p188_p4 = pnand %p187_p3, %p181_p0 }
   0xb   :  { %191 = shalt.err (!%p188_p4)
}
   0xc   :  { %s239_s12 = smov 128   ;;  %s240_s13 = smov 8  }
   0xd   :  { %21 = dma.hbm_to_vmem [thread:$0]  %s278_s0, 256, %s16_s10, [#allocation3], %s239_s12, %s239_s12, %s240_s13  }
   0xe   :  { %s241_s16 = smov [#allocation5]  }
   0xf   :  { %s27_s17 = sshll.u32 %s241_s16, 4  ;;  %s28_s17 = int_to_ptr.vmem [resolvable:$true] %s27_s17 }
  0x10   :  { %s200_s18 = scalar_lea.vmem %s28_s17, 512  ;;  %p205_p6 = scmp.lt.s32.totalorder %s28_s17, %s28_s17 }
  0x11   :  { %p201_p5 = scmp.ne.s32.totalorder %s28_s17, %s200_s18  ;;  %p206_p7 = scmp.lt.s32.totalorder %s200_s18, %s200_s18 }
  0x13   :  { %p207_p8 = por %p206_p7, %p205_p6 }
  0x15   :  { %p208_p9 = pnand %p207_p8, %p201_p5 }
  0x17   :  { %211 = shalt.err (!%p208_p9)
}
  0x18   :  { %33 = dma.hbm_to_vmem [thread:$0]  %s279_s1, 512, %s28_s17, [#allocation6], %s239_s12, %s239_s12, %s240_s13  }
  0x19   :  { %232 = dma.done.wait [#allocation3], 256  }
  0x1a   :  { %233 = vsyncadd [#allocation3], 4294967040 }
  0x1b   :  { %234 = dma.done.wait [#allocation6], 512  }
  0x1c   :  { %235 = vsyncadd [#allocation6], 4294966784  ;;  %vm46_vm0 = vcmask 261120   ;;  %v45_v0 = vld [vmem:[#allocation5 + $0x18] sm:$0xff]  ;;  %v44_v1 = vld [vmem:[#allocation5 + $0x10] sm:$0xff]  ;;  %s242_s0 = smov [#allocation7]  }
  0x1d   :  { %156 = vmatprep.subr.mxu0 %v45_v0  ;;  %v40_v2 = vld [vmem:[#allocation2] sm:$0xff]  ;;  %v43_v3 = vld [vmem:[#allocation5 + $0x8] sm:$0xff]  ;;  %v42_v4 = vld [vmem:[#allocation5] sm:$0xff]  ;;  %s135_s1 = sshll.u32 %s242_s0, 4  ;;  %s136_s1 = int_to_ptr.vmem [resolvable:$true] %s135_s1 }
  0x1e   :  { %157 = vmatpush3.msra.mxu0 %v45_v0  ;;  %164 = vmatprep.mubr.msk.f32.mxu0 %vm46_vm0, %v40_v2  ;;  %v41_v5 = vld [vmem:[#allocation2 + $0x8] sm:$0xff]  ;;  %s212_s21 = scalar_lea.vmem %s136_s1, 256  ;;  %p217_p11 = scmp.lt.s32.totalorder %s136_s1, %s136_s1 }
  0x1f   :  { %158 = vmatprep.subr.mxu0 %v44_v1  ;;  %p213_p10 = scmp.ne.s32.totalorder %s136_s1, %s212_s21  ;;  %p218_p12 = scmp.lt.s32.totalorder %s212_s21, %s212_s21 }
  0x20   :  { %159 = vmatpush3.msra.mxu0 %v44_v1 }
  0x21   :  { %160 = vmatprep.subr.mxu0 %v43_v3  ;;  %p219_p13 = por %p218_p12, %p217_p11 }
  0x22   :  { %161 = vmatpush3.msra.mxu0 %v43_v3 }
  0x23   :  { %162 = vmatprep.subr.mxu0 %v42_v4  ;;  %p220_p0 = pnand %p219_p13, %p213_p10 }
  0x24   :  { %163 = vmatpush3.msra.mxu0 %v42_v4 }
  0x25   :  { %165 = vmatmul.mubr.msk.f32.vlgmr.msra.gmra.mxu0 %vm46_vm0, %v41_v5 }
  0xe5   :  { %v166_v6 = vpop.f32.mrf.mxu0 }
  0xe6   :  { %129 = vst [vmem:[#allocation7 + $0x8] sm:$0xff] %v166_v6 }
  0xe7   :  { %v119_v7 = vpop.f32.mrf.mxu0 }
  0xe8   :  { %128 = vst [vmem:[#allocation7] sm:$0xff] %v119_v7 }
  0xe9   :  { %223 = shalt.err (!%p220_p0)
}
  0xea   :  { %141 = dma.vmem_to_hbm [thread:$0]  %s136_s1, 256, %s280_s2, [#allocation4], %s239_s12, %s239_s12, %s240_s13  }
  0xeb   :  { %236 = dma.done.wait [#allocation4], 256  }
  0xec   :  { %237 = vsyncadd [#allocation4], 4294967040 }
  0xed   :  { %145 = vsyncpa [#allocation3], 1 }
  0xee   :  { %146 = vsyncpa [#allocation6], 1 }
  0xef   :  { %147 = vsyncpa [#allocation4], 1 }

</bundles_post_ra>
